<compile_context>
chip_gen: v7x
topology: tpu7x:2x2x1
jax: 0.10.0
libtpu: 0.0.40
codegen_flags: <defaults>
</compile_context>

<pallas_src>
import functools
import warnings

import jax
import jax.numpy as jnp
from jax.experimental import pallas as pl
from jax.experimental.pallas import tpu as pltpu

LN_EPS = 1e-5

_PARAM_ORDER = ('ln1_w', 'ln1_b', 'wqkv', 'bqkv', 'wo', 'bo',
                'ln2_w', 'ln2_b', 'wfc', 'bfc', 'wproj', 'bproj')


def _layernorm_f32(v, w, b):
    # v: (..., D) f32; w/b: (1, D) f32.  Matches torch LayerNorm (fp32 compute).
    mu = jnp.mean(v, axis=-1, keepdims=True)
    var = jnp.mean((v - mu) ** 2, axis=-1, keepdims=True)
    return (v - mu) * jax.lax.rsqrt(var + LN_EPS) * w + b


def _transformer_kernel(*refs, n_heads, has_mask, ff_chunk):
    # refs = (x, [mask], 12 per-layer weight refs, out, carry)
    x_ref = refs[0]
    mask_ref = refs[1] if has_mask else None
    idx = 2 if has_mask else 1
    (ln1_w_ref, ln1_b_ref, wqkv_ref, bqkv_ref, wo_ref, bo_ref,
     ln2_w_ref, ln2_b_ref, wfc_ref, bfc_ref, wproj_ref, bproj_ref) = refs[idx:idx + 12]
    out_ref = refs[idx + 12]
    carry = refs[idx + 13]                      # f32 residual-stream scratch (bb, S, D)

    l = pl.program_id(1)
    n_layers = pl.num_programs(1)

    Bb, S, D = x_ref.shape
    H = n_heads
    Dh = D // H
    N = Bb * S
    Dff = wfc_ref.shape[-1]
    mxu_dtype = wqkv_ref.dtype                  # bf16 weights -> bf16 MXU operands
    scale = 1.0 / float(Dh) ** 0.5

    # Layer 0: load this batch block into the f32 carry (stays resident across layers).
    @pl.when(l == 0)
    def _():
        carry[...] = x_ref[...].astype(jnp.float32)

    x = carry[...]                              # (Bb, S, D) f32

    # ---------------- attention branch: x + out_proj(MHA(LN1(x))) ----------------
    h = _layernorm_f32(x, ln1_w_ref[0], ln1_b_ref[0]).reshape(N, D).astype(mxu_dtype)
    wqkv = wqkv_ref[0]                          # (D, 3D) bf16
    bqkv = bqkv_ref[0]                          # (1, 3D) f32
    # Separate Q / K / V projections against column slices of wqkv: avoids having
    # the (N, 3D) f32 qkv buffer plus three bf16 copies live simultaneously.
    # The 1/sqrt(Dh) scale is folded into q before the QK matmul.
    q = ((jnp.dot(h, wqkv[:, 0:D], preferred_element_type=jnp.float32)
          + bqkv[:, 0:D]) * scale).astype(mxu_dtype)
    k = (jnp.dot(h, wqkv[:, D:2 * D], preferred_element_type=jnp.float32)
         + bqkv[:, D:2 * D]).astype(mxu_dtype)
    v = (jnp.dot(h, wqkv[:, 2 * D:3 * D], preferred_element_type=jnp.float32)
         + bqkv[:, 2 * D:3 * D]).astype(mxu_dtype)

    # Head-batched attention: gather each head's lane slice into a (H*Bb, S, Dh)
    # batch so QK^T, softmax and PV each run as a single batched op (no per-head
    # Python pipeline keeping H sets of intermediates live).
    def to_heads(m):                            # (N, D) -> (H*Bb, S, Dh)
        m3 = m.reshape(Bb, S, D)
        return jnp.concatenate(
            [m3[:, :, hh * Dh:(hh + 1) * Dh] for hh in range(H)], axis=0)

    qh = to_heads(q)
    kh = to_heads(k)
    vh = to_heads(v)

    # TODO(synk): for S >= ~512, switch to a kv-tiled flash-style accumulation and
    # pad the KV length to a multiple of 128 so the softmax reduce axis is lane-dense.
    sc = jnp.einsum('bqd,bkd->bqk', qh, kh,
                    preferred_element_type=jnp.float32)        # (H*Bb, S, S) f32
    if mask_ref is not None:
        sc = sc + mask_ref[...].astype(jnp.float32)            # (S, S) additive
    sc = sc - jnp.max(sc, axis=-1, keepdims=True)
    p = jnp.exp(sc)
    p = p * pl.reciprocal(jnp.sum(p, axis=-1, keepdims=True), approx=True)
    ctx = jnp.einsum('bqk,bkd->bqd', p.astype(mxu_dtype), vh,
                     preferred_element_type=jnp.float32)       # (H*Bb, S, Dh) f32

    # Reassemble contexts head-major back into (N, D) lanes and apply the output
    # projection as ONE dense (N, D) x (D, D) MXU matmul (full K depth).
    ctx = jnp.concatenate(
        [ctx[hh * Bb:(hh + 1) * Bb] for hh in range(H)], axis=-1)   # (Bb, S, D)
    attn = jnp.dot(ctx.reshape(N, D).astype(mxu_dtype), wo_ref[0],
                   preferred_element_type=jnp.float32) + bo_ref[0]  # (N, D) f32
    x = x + attn.reshape(Bb, S, D)

    # ---------------- MLP branch: x + c_proj(QuickGELU(c_fc(LN2(x)))) ----------------
    h2 = _layernorm_f32(x, ln2_w_ref[0], ln2_b_ref[0]).reshape(N, D).astype(mxu_dtype)
    wfc = wfc_ref[0]                            # (D, 4D) bf16
    bfc = bfc_ref[0]                            # (1, 4D) f32
    wproj = wproj_ref[0]                        # (4D, D) bf16
    # Hidden dim chunking: bounds the f32 (N, chunk) intermediate at large widths.
    # TODO(synk): for D >= ~768 on v7x also tile wfc/wproj at the BlockSpec level
    # (extra grid axis) so double-buffered weights themselves fit 64 MiB VMEM.
    mlp = None
    for c0 in range(0, Dff, ff_chunk):
        ffc = (jnp.dot(h2, wfc[:, c0:c0 + ff_chunk], preferred_element_type=jnp.float32)
               + bfc[:, c0:c0 + ff_chunk])
        ffc = ffc * jax.nn.sigmoid(1.702 * ffc)          # QuickGELU (f32 VPU/EUP)
        part = jnp.dot(ffc.astype(mxu_dtype), wproj[c0:c0 + ff_chunk, :],
                       preferred_element_type=jnp.float32)
        mlp = part if mlp is None else mlp + part
    x = x + (mlp + bproj_ref[0]).reshape(Bb, S, D)

    carry[...] = x

    @pl.when(l == n_layers - 1)
    def _():
        out_ref[...] = x.astype(out_ref.dtype)


def _vmem_limit_bytes():
    """Generation-aware VMEM budget: ~3/4 of physical capacity
    (v7x 64 MiB -> 48 MiB, v5e/v6e 128 MiB -> 96 MiB)."""
    cap = 64 * 1024 * 1024
    try:
        info = pltpu.get_tpu_info()
        cap = int(getattr(info, 'vmem_capacity_bytes', cap))
    except Exception:
        pass
    return (cap * 3) // 4


def _pick_ff_chunk(d_ff):
    """MLP hidden-dim chunk so the f32 (rows, chunk) intermediate stays bounded."""
    if d_ff <= 2048:
        return d_ff
    for c in (2048, 1536, 1024, 768, 512, 384, 256, 128):
        if d_ff % c == 0:
            return c
    return d_ff


def _pick_batch_block(B, S, D, H, ff_chunk, vmem_limit):
    """Largest divisor of B whose (bb, S, D) tile + per-layer double-buffered bf16
    weights fit the VMEM budget.  Bigger blocks => fewer passes over the weight
    stack (each batch block re-reads every layer's weights from HBM)."""
    d_ff = 4 * D
    weight_bytes = 2 * 2 * (3 * D * D + D * D + D * d_ff + d_ff * D)
    budget = max(vmem_limit - weight_bytes - (2 << 20), 2 << 20)
    per_example = (
        S * D * 4 * 1          # f32 residual carry
        + S * D * 4 * 4        # double-buffered input + output activation blocks
        + S * D * 2 * 3        # bf16 q / k / v
        + H * S * S * 4 * 2    # f32 scores + probs
        + S * ff_chunk * 4     # f32 MLP hidden chunk
        + S * D * 4 * 3        # LN outputs / attention out / MLP accumulator
    )
    target = max(1, budget // per_example)
    best = 1
    for bb in range(1, B + 1):
        if B % bb == 0 and bb <= target:
            best = bb
    # v7x megacore: prefer >= 2 parallel batch blocks (both TensorCores busy) as
    # long as it does not blow up the weight re-stream count.
    if best == B and B > 1:
        proper = max(bb for bb in range(1, B) if B % bb == 0)
        if B // proper <= 4:
            best = proper
    if B // best >= 8:
        warnings.warn(
            f"Transformer Pallas kernel: batch block {best} re-streams the full "
            f"weight stack {B // best} times per forward; consider padding the batch.")
    # TODO(synk): for weight-dominated regimes (B//bb still large), flip the grid
    # to layers-outer with the residual stream carried through HBM via
    # input_output_aliases so each layer's weights are read exactly once.
    return best


def _build_call(x_bsd_shape, x_dtype, params, n_heads, bb, ff_chunk, has_mask,
                vmem_limit):
    B, S, D = x_bsd_shape
    assert D % n_heads == 0, "width must be divisible by n_heads"
    L = params['wqkv'].shape[0]
    grid = (B // bb, L)

    def act_map(b, l):
        return (b, 0, 0)

    def mask_map(b, l):
        return (0, 0)

    def layer_map(b, l):
        return (l, 0, 0)

    in_specs = [pl.BlockSpec((bb, S, D), act_map)]
    if has_mask:
        in_specs.append(pl.BlockSpec((S, S), mask_map))
    for name in _PARAM_ORDER:
        p = params[name]
        in_specs.append(pl.BlockSpec((1,) + p.shape[1:], layer_map))

    kernel = functools.partial(_transformer_kernel, n_heads=n_heads,
                               has_mask=has_mask, ff_chunk=ff_chunk)
    return pl.pallas_call(
        kernel,
        out_shape=jax.ShapeDtypeStruct((B, S, D), x_dtype),
        grid=grid,
        in_specs=in_specs,
        out_specs=pl.BlockSpec((bb, S, D), act_map),
        scratch_shapes=[pltpu.VMEM((bb, S, D), jnp.float32)],
        compiler_params=pltpu.CompilerParams(
            dimension_semantics=("parallel", "arbitrary"),
            vmem_limit_bytes=vmem_limit),
    )


def init_transformer_params(key, width, layers, heads, param_dtype=jnp.bfloat16):
    """Synthetic parameters, stacked over layers and pre-transposed so the kernel
    computes y = x @ W with W stored as (in_features, out_features).  Matmul weights
    use `param_dtype` (bf16 feeds the MXU at full rate); LN params / biases stay f32."""
    del heads  # head count only affects how the kernel interprets wqkv/wo
    D = width

    def w(l, idx, shape):
        k = jax.random.split(jax.random.fold_in(key, l), 4)[idx]
        return (0.02 * jax.random.normal(k, shape, jnp.float32)).astype(param_dtype)

    def stack(fn):
        return jnp.stack([fn(l) for l in range(layers)], axis=0)

    return dict(
        ln1_w=jnp.ones((layers, 1, D), jnp.float32),
        ln1_b=jnp.zeros((layers, 1, D), jnp.float32),
        wqkv=stack(lambda l: w(l, 0, (D, 3 * D))),        # in_proj_weight^T
        bqkv=jnp.zeros((layers, 1, 3 * D), jnp.float32),
        wo=stack(lambda l: w(l, 1, (D, D))),              # out_proj.weight^T
        bo=jnp.zeros((layers, 1, D), jnp.float32),
        ln2_w=jnp.ones((layers, 1, D), jnp.float32),
        ln2_b=jnp.zeros((layers, 1, D), jnp.float32),
        wfc=stack(lambda l: w(l, 2, (D, 4 * D))),         # c_fc.weight^T
        bfc=jnp.zeros((layers, 1, 4 * D), jnp.float32),
        wproj=stack(lambda l: w(l, 3, (4 * D, D))),       # c_proj.weight^T
        bproj=jnp.zeros((layers, 1, D), jnp.float32),
    )


def transformer_forward(x_sbd, params, n_heads, attn_mask=None):
    """x_sbd: [S, B, D] (same axis convention as the torch module).
    attn_mask: optional (S, S) additive mask (e.g. causal), shared by all layers."""
    S, B, D = x_sbd.shape
    assert D % n_heads == 0
    vmem_limit = _vmem_limit_bytes()
    d_ff = params['wfc'].shape[-1]
    ff_chunk = _pick_ff_chunk(d_ff)
    bb = _pick_batch_block(B, S, D, n_heads, ff_chunk, vmem_limit)
    call = _build_call((B, S, D), x_sbd.dtype, params, n_heads, bb, ff_chunk,
                       attn_mask is not None, vmem_limit)
    # TODO(synk): fold this [S,B,D] <-> [B,S,D] relayout into the kernel (in-VMEM
    # transpose of the already-resident tile) to drop two HBM activation passes.
    x = jnp.transpose(x_sbd, (1, 0, 2))                   # -> [B, S, D]
    args = [x]
    if attn_mask is not None:
        args.append(attn_mask.astype(jnp.float32))
    args.extend(params[name] for name in _PARAM_ORDER)
    y = call(*args)
    return jnp.transpose(y, (1, 0, 2))                    # back to [S, B, D]


if __name__ == "__main__":
    # Small shapes consistent with the module: Transformer(width=32, layers=2, heads=4)
    SEQ, BATCH, WIDTH, HEADS, LAYERS = 8, 2, 32, 4, 2

    key = jax.random.PRNGKey(0)
    kx, kp = jax.random.split(key)
    x = jax.random.normal(kx, (SEQ, BATCH, WIDTH), dtype=jnp.float32)
    params = init_transformer_params(kp, WIDTH, LAYERS, HEADS, param_dtype=jnp.bfloat16)

    fwd = jax.jit(transformer_forward, static_argnums=(2,))

    # Unmasked (vision-tower style) forward.
    out = jax.block_until_ready(fwd(x, params, HEADS))
    assert out.shape == (SEQ, BATCH, WIDTH)
    assert bool(jnp.all(jnp.isfinite(out)))

    # Causal-mask (text-tower style) forward, exercising the attn_mask path.
    causal = jnp.triu(jnp.full((SEQ, SEQ), -1e9, jnp.float32), k=1)
    out_m = jax.block_until_ready(fwd(x, params, HEADS, causal))
    assert out_m.shape == (SEQ, BATCH, WIDTH)
    assert bool(jnp.all(jnp.isfinite(out_m)))

    print("KERNEL_OK")
</pallas_src>

<mosaic_0001>
module attributes {stable_mosaic.version = 11 : i64} {
  func.func @_transformer_kernel(%arg0: i32, %arg1: i32, %arg2: memref<1x8x32xf32, #tpu.memory_space<vmem>>, %arg3: memref<1x1x32xf32, #tpu.memory_space<vmem>>, %arg4: memref<1x1x32xf32, #tpu.memory_space<vmem>>, %arg5: memref<1x32x96xbf16, #tpu.memory_space<vmem>>, %arg6: memref<1x1x96xf32, #tpu.memory_space<vmem>>, %arg7: memref<1x32x32xbf16, #tpu.memory_space<vmem>>, %arg8: memref<1x1x32xf32, #tpu.memory_space<vmem>>, %arg9: memref<1x1x32xf32, #tpu.memory_space<vmem>>, %arg10: memref<1x1x32xf32, #tpu.memory_space<vmem>>, %arg11: memref<1x32x128xbf16, #tpu.memory_space<vmem>>, %arg12: memref<1x1x128xf32, #tpu.memory_space<vmem>>, %arg13: memref<1x128x32xbf16, #tpu.memory_space<vmem>>, %arg14: memref<1x1x32xf32, #tpu.memory_space<vmem>>, %arg15: memref<1x8x32xf32, #tpu.memory_space<vmem>>, %arg16: memref<1x8x32xf32, #tpu.memory_space<vmem>>) attributes {dimension_semantics = [#tpu.dimension_semantics<parallel>, #tpu.dimension_semantics<arbitrary>], iteration_bounds = array<i64: 2, 2>, scalar_prefetch = 0 : i64, scratch_operands = 1 : i64, tpu.core_type = #tpu.core_type<tc>, window_params = [{transform_indices = @transform_0, window_bounds = array<i64: 1, 8, 32>}, {transform_indices = @transform_1, window_bounds = array<i64: 1, 1, 32>}, {transform_indices = @transform_2, window_bounds = array<i64: 1, 1, 32>}, {transform_indices = @transform_3, window_bounds = array<i64: 1, 32, 96>}, {transform_indices = @transform_4, window_bounds = array<i64: 1, 1, 96>}, {transform_indices = @transform_5, window_bounds = array<i64: 1, 32, 32>}, {transform_indices = @transform_6, window_bounds = array<i64: 1, 1, 32>}, {transform_indices = @transform_7, window_bounds = array<i64: 1, 1, 32>}, {transform_indices = @transform_8, window_bounds = array<i64: 1, 1, 32>}, {transform_indices = @transform_9, window_bounds = array<i64: 1, 32, 128>}, {transform_indices = @transform_10, window_bounds = array<i64: 1, 1, 128>}, {transform_indices = @transform_11, window_bounds = array<i64: 1, 128, 32>}, {transform_indices = @transform_12, window_bounds = array<i64: 1, 1, 32>}, {transform_indices = @transform_13, window_bounds = array<i64: 1, 8, 32>}]} {
    %c0_i32 = arith.constant 0 : i32
    %0 = arith.cmpi eq, %arg1, %c0_i32 : i32
    %1 = arith.extui %0 : i1 to i32
    %c0_i32_0 = arith.constant 0 : i32
    %2 = arith.cmpi ne, %1, %c0_i32_0 : i32
    scf.if %2 {
      %c0_65 = arith.constant 0 : index
      %c0_66 = arith.constant 0 : index
      %c0_67 = arith.constant 0 : index
      %164 = vector.load %arg2[%c0_65, %c0_66, %c0_67] : memref<1x8x32xf32, #tpu.memory_space<vmem>>, vector<1x8x32xf32>
      %c0_68 = arith.constant 0 : index
      %c0_69 = arith.constant 0 : index
      %c0_70 = arith.constant 0 : index
      %165 = vector.load %arg16[%c0_68, %c0_69, %c0_70] : memref<1x8x32xf32, #tpu.memory_space<vmem>>, vector<1x8x32xf32>
      tpu.vector_store %arg16[%c0_68, %c0_69, %c0_70], %164 {strides = array<i32>} : memref<1x8x32xf32, #tpu.memory_space<vmem>>, vector<1x8x32xf32>,
    } else {
    }
    %c0 = arith.constant 0 : index
    %c0_1 = arith.constant 0 : index
    %c0_2 = arith.constant 0 : index
    %3 = vector.load %arg16[%c0, %c0_1, %c0_2] : memref<1x8x32xf32, #tpu.memory_space<vmem>>, vector<1x8x32xf32>
    %c0_3 = arith.constant 0 : index
    %c0_4 = arith.constant 0 : index
    %c0_5 = arith.constant 0 : index
    %4 = vector.load %arg3[%c0_3, %c0_4, %c0_5] : memref<1x1x32xf32, #tpu.memory_space<vmem>>, vector<1x1x32xf32>
    %5 = vector.shape_cast %4 : vector<1x1x32xf32> to vector<1x32xf32>
    %c0_6 = arith.constant 0 : index
    %c0_7 = arith.constant 0 : index
    %c0_8 = arith.constant 0 : index
    %6 = vector.load %arg4[%c0_6, %c0_7, %c0_8] : memref<1x1x32xf32, #tpu.memory_space<vmem>>, vector<1x1x32xf32>
    %7 = vector.shape_cast %6 : vector<1x1x32xf32> to vector<1x32xf32>
    %cst = arith.constant dense<0.000000e+00> : vector<1x8xf32>
    %8 = vector.multi_reduction <add>, %3, %cst [2] : vector<1x8x32xf32> to vector<1x8xf32>
    %9 = vector.shape_cast %8 : vector<1x8xf32> to vector<1x8x1xf32>
    %cst_9 = arith.constant 3.200000e+01 : f32
    %10 = vector.broadcast %cst_9 : f32 to vector<1x8x1xf32>
    %11 = arith.divf %9, %10 : vector<1x8x1xf32>
    %12 = vector.broadcast %11 : vector<1x8x1xf32> to vector<1x8x32xf32>
    %13 = arith.subf %3, %12 : vector<1x8x32xf32>
    %14 = arith.mulf %13, %13 : vector<1x8x32xf32>
    %cst_10 = arith.constant dense<0.000000e+00> : vector<1x8xf32>
    %15 = vector.multi_reduction <add>, %14, %cst_10 [2] : vector<1x8x32xf32> to vector<1x8xf32>
    %16 = vector.shape_cast %15 : vector<1x8xf32> to vector<1x8x1xf32>
    %cst_11 = arith.constant 3.200000e+01 : f32
    %17 = vector.broadcast %cst_11 : f32 to vector<1x8x1xf32>
    %18 = arith.divf %16, %17 : vector<1x8x1xf32>
    %19 = vector.broadcast %11 : vector<1x8x1xf32> to vector<1x8x32xf32>
    %20 = arith.subf %3, %19 : vector<1x8x32xf32>
    %cst_12 = arith.constant 9.99999974E-6 : f32
    %21 = vector.broadcast %cst_12 : f32 to vector<1x8x1xf32>
    %22 = arith.addf %18, %21 : vector<1x8x1xf32>
    %23 = math.rsqrt %22 : vector<1x8x1xf32>
    %24 = vector.broadcast %23 : vector<1x8x1xf32> to vector<1x8x32xf32>
    %25 = arith.mulf %20, %24 : vector<1x8x32xf32>
    %26 = vector.shape_cast %5 : vector<1x32xf32> to vector<1x1x32xf32>
    %27 = vector.broadcast %26 : vector<1x1x32xf32> to vector<1x8x32xf32>
    %28 = arith.mulf %25, %27 : vector<1x8x32xf32>
    %29 = vector.shape_cast %7 : vector<1x32xf32> to vector<1x1x32xf32>
    %30 = vector.broadcast %29 : vector<1x1x32xf32> to vector<1x8x32xf32>
    %31 = arith.addf %28, %30 : vector<1x8x32xf32>
    %32 = vector.shape_cast %31 : vector<1x8x32xf32> to vector<8x32xf32>
    %33 = arith.truncf %32 : vector<8x32xf32> to vector<8x32xbf16>
    %c0_13 = arith.constant 0 : index
    %c0_14 = arith.constant 0 : index
    %c0_15 = arith.constant 0 : index
    %34 = vector.load %arg5[%c0_13, %c0_14, %c0_15] : memref<1x32x96xbf16, #tpu.memory_space<vmem>>, vector<1x32x96xbf16>
    %35 = vector.shape_cast %34 : vector<1x32x96xbf16> to vector<32x96xbf16>
    %c0_16 = arith.constant 0 : index
    %c0_17 = arith.constant 0 : index
    %c0_18 = arith.constant 0 : index
    %36 = vector.load %arg6[%c0_16, %c0_17, %c0_18] : memref<1x1x96xf32, #tpu.memory_space<vmem>>, vector<1x1x96xf32>
    %37 = vector.shape_cast %36 : vector<1x1x96xf32> to vector<1x96xf32>
    %38 = vector.extract_strided_slice %35 {offsets = [0, 0], sizes = [32, 32], strides = [1, 1]} : vector<32x96xbf16> to vector<32x32xbf16>
    %cst_19 = arith.constant dense<0.000000e+00> : vector<8x32xf32>
    %39 = tpu.matmul %33, %38, %cst_19 {dimension_numbers = #tpu.dot_dimension_numbers<[1], [0], [0], [1], [0, 0, 1, 1], [], []>} : vector<8x32xbf16>, vector<32x32xbf16>, vector<8x32xf32> -> vector<8x32xf32>
    %40 = vector.extract_strided_slice %37 {offsets = [0, 0], sizes = [1, 32], strides = [1, 1]} : vector<1x96xf32> to vector<1x32xf32>
    %41 = vector.broadcast %40 : vector<1x32xf32> to vector<8x32xf32>
    %42 = arith.addf %39, %41 : vector<8x32xf32>
    %cst_20 = arith.constant 0.353553385 : f32
    %43 = vector.broadcast %cst_20 : f32 to vector<8x32xf32>
    %44 = arith.mulf %42, %43 : vector<8x32xf32>
    %45 = arith.truncf %44 : vector<8x32xf32> to vector<8x32xbf16>
    %46 = vector.extract_strided_slice %35 {offsets = [0, 32], sizes = [32, 32], strides = [1, 1]} : vector<32x96xbf16> to vector<32x32xbf16>
    %cst_21 = arith.constant dense<0.000000e+00> : vector<8x32xf32>
    %47 = tpu.matmul %33, %46, %cst_21 {dimension_numbers = #tpu.dot_dimension_numbers<[1], [0], [0], [1], [0, 0, 1, 1], [], []>} : vector<8x32xbf16>, vector<32x32xbf16>, vector<8x32xf32> -> vector<8x32xf32>
    %48 = vector.extract_strided_slice %37 {offsets = [0, 32], sizes = [1, 32], strides = [1, 1]} : vector<1x96xf32> to vector<1x32xf32>
    %49 = vector.broadcast %48 : vector<1x32xf32> to vector<8x32xf32>
    %50 = arith.addf %47, %49 : vector<8x32xf32>
    %51 = arith.truncf %50 : vector<8x32xf32> to vector<8x32xbf16>
    %52 = vector.extract_strided_slice %35 {offsets = [0, 64], sizes = [32, 32], strides = [1, 1]} : vector<32x96xbf16> to vector<32x32xbf16>
    %cst_22 = arith.constant dense<0.000000e+00> : vector<8x32xf32>
    %53 = tpu.matmul %33, %52, %cst_22 {dimension_numbers = #tpu.dot_dimension_numbers<[1], [0], [0], [1], [0, 0, 1, 1], [], []>} : vector<8x32xbf16>, vector<32x32xbf16>, vector<8x32xf32> -> vector<8x32xf32>
    %54 = vector.extract_strided_slice %37 {offsets = [0, 64], sizes = [1, 32], strides = [1, 1]} : vector<1x96xf32> to vector<1x32xf32>
    %55 = vector.broadcast %54 : vector<1x32xf32> to vector<8x32xf32>
    %56 = arith.addf %53, %55 : vector<8x32xf32>
    %57 = arith.truncf %56 : vector<8x32xf32> to vector<8x32xbf16>
    %58 = vector.shape_cast %45 : vector<8x32xbf16> to vector<1x8x32xbf16>
    %59 = vector.extract_strided_slice %58 {offsets = [0, 0, 0], sizes = [1, 8, 8], strides = [1, 1, 1]} : vector<1x8x32xbf16> to vector<1x8x8xbf16>
    %60 = vector.extract_strided_slice %58 {offsets = [0, 0, 8], sizes = [1, 8, 8], strides = [1, 1, 1]} : vector<1x8x32xbf16> to vector<1x8x8xbf16>
    %61 = vector.extract_strided_slice %58 {offsets = [0, 0, 16], sizes = [1, 8, 8], strides = [1, 1, 1]} : vector<1x8x32xbf16> to vector<1x8x8xbf16>
    %62 = vector.extract_strided_slice %58 {offsets = [0, 0, 24], sizes = [1, 8, 8], strides = [1, 1, 1]} : vector<1x8x32xbf16> to vector<1x8x8xbf16>
    %63 = tpu.concatenate %59, %60, %61, %62 in 0 : vector<1x8x8xbf16>, vector<1x8x8xbf16>, vector<1x8x8xbf16>, vector<1x8x8xbf16> -> vector<4x8x8xbf16>
    %64 = vector.shape_cast %51 : vector<8x32xbf16> to vector<1x8x32xbf16>
    %65 = vector.extract_strided_slice %64 {offsets = [0, 0, 0], sizes = [1, 8, 8], strides = [1, 1, 1]} : vector<1x8x32xbf16> to vector<1x8x8xbf16>
    %66 = vector.extract_strided_slice %64 {offsets = [0, 0, 8], sizes = [1, 8, 8], strides = [1, 1, 1]} : vector<1x8x32xbf16> to vector<1x8x8xbf16>
    %67 = vector.extract_strided_slice %64 {offsets = [0, 0, 16], sizes = [1, 8, 8], strides = [1, 1, 1]} : vector<1x8x32xbf16> to vector<1x8x8xbf16>
    %68 = vector.extract_strided_slice %64 {offsets = [0, 0, 24], sizes = [1, 8, 8], strides = [1, 1, 1]} : vector<1x8x32xbf16> to vector<1x8x8xbf16>
    %69 = tpu.concatenate %65, %66, %67, %68 in 0 : vector<1x8x8xbf16>, vector<1x8x8xbf16>, vector<1x8x8xbf16>, vector<1x8x8xbf16> -> vector<4x8x8xbf16>
    %70 = vector.shape_cast %57 : vector<8x32xbf16> to vector<1x8x32xbf16>
    %71 = vector.extract_strided_slice %70 {offsets = [0, 0, 0], sizes = [1, 8, 8], strides = [1, 1, 1]} : vector<1x8x32xbf16> to vector<1x8x8xbf16>
    %72 = vector.extract_strided_slice %70 {offsets = [0, 0, 8], sizes = [1, 8, 8], strides = [1, 1, 1]} : vector<1x8x32xbf16> to vector<1x8x8xbf16>
    %73 = vector.extract_strided_slice %70 {offsets = [0, 0, 16], sizes = [1, 8, 8], strides = [1, 1, 1]} : vector<1x8x32xbf16> to vector<1x8x8xbf16>
    %74 = vector.extract_strided_slice %70 {offsets = [0, 0, 24], sizes = [1, 8, 8], strides = [1, 1, 1]} : vector<1x8x32xbf16> to vector<1x8x8xbf16>
    %75 = tpu.concatenate %71, %72, %73, %74 in 0 : vector<1x8x8xbf16>, vector<1x8x8xbf16>, vector<1x8x8xbf16>, vector<1x8x8xbf16> -> vector<4x8x8xbf16>
    "tpu.trace_start"() <{level = 10 : i32, message = "bqd,bkd->bqk"}> : () -> ()
    %cst_23 = arith.constant dense<0.000000e+00> : vector<4x8x8xf32>
    %76 = tpu.matmul %63, %69, %cst_23 {dimension_numbers = #tpu.dot_dimension_numbers<[2], [2], [1], [1], [0, 0, 0, 1, 1, 1], [0], [0]>} : vector<4x8x8xbf16>, vector<4x8x8xbf16>, vector<4x8x8xf32> -> vector<4x8x8xf32>
    "tpu.trace_stop"() : () -> ()
    %cst_24 = arith.constant dense<0xFF800000> : vector<4x8xf32>
    %77 = vector.multi_reduction <maximumf>, %76, %cst_24 [2] : vector<4x8x8xf32> to vector<4x8xf32>
    %78 = vector.shape_cast %77 : vector<4x8xf32> to vector<4x8x1xf32>
    %79 = vector.broadcast %78 : vector<4x8x1xf32> to vector<4x8x8xf32>
    %80 = arith.subf %76, %79 : vector<4x8x8xf32>
    %81 = math.exp %80 : vector<4x8x8xf32>
    %cst_25 = arith.constant dense<0.000000e+00> : vector<4x8xf32>
    %82 = vector.multi_reduction <add>, %81, %cst_25 [2] : vector<4x8x8xf32> to vector<4x8xf32>
    %83 = vector.shape_cast %82 : vector<4x8xf32> to vector<4x8x1xf32>
    %84 = tpu.reciprocal %83 {approx = true} : vector<4x8x1xf32> -> vector<4x8x1xf32>
    %85 = vector.broadcast %84 : vector<4x8x1xf32> to vector<4x8x8xf32>
    %86 = arith.mulf %81, %85 : vector<4x8x8xf32>
    %87 = arith.truncf %86 : vector<4x8x8xf32> to vector<4x8x8xbf16>
    "tpu.trace_start"() <{level = 10 : i32, message = "bqk,bkd->bqd"}> : () -> ()
    %cst_26 = arith.constant dense<0.000000e+00> : vector<4x8x8xf32>
    %88 = tpu.matmul %87, %75, %cst_26 {dimension_numbers = #tpu.dot_dimension_numbers<[2], [1], [1], [2], [0, 0, 0, 1, 1, 2], [0], [0]>} : vector<4x8x8xbf16>, vector<4x8x8xbf16>, vector<4x8x8xf32> -> vector<4x8x8xf32>
    "tpu.trace_stop"() : () -> ()
    %89 = vector.extract_strided_slice %88 {offsets = [0, 0, 0], sizes = [1, 8, 8], strides = [1, 1, 1]} : vector<4x8x8xf32> to vector<1x8x8xf32>
    %90 = vector.extract_strided_slice %88 {offsets = [1, 0, 0], sizes = [1, 8, 8], strides = [1, 1, 1]} : vector<4x8x8xf32> to vector<1x8x8xf32>
    %91 = vector.extract_strided_slice %88 {offsets = [2, 0, 0], sizes = [1, 8, 8], strides = [1, 1, 1]} : vector<4x8x8xf32> to vector<1x8x8xf32>
    %92 = vector.extract_strided_slice %88 {offsets = [3, 0, 0], sizes = [1, 8, 8], strides = [1, 1, 1]} : vector<4x8x8xf32> to vector<1x8x8xf32>
    %93 = tpu.concatenate %89, %90, %91, %92 in 2 : vector<1x8x8xf32>, vector<1x8x8xf32>, vector<1x8x8xf32>, vector<1x8x8xf32> -> vector<1x8x32xf32>
    %94 = vector.shape_cast %93 : vector<1x8x32xf32> to vector<8x32xf32>
    %95 = arith.truncf %94 : vector<8x32xf32> to vector<8x32xbf16>
    %c0_27 = arith.constant 0 : index
    %c0_28 = arith.constant 0 : index
    %c0_29 = arith.constant 0 : index
    %96 = vector.load %arg7[%c0_27, %c0_28, %c0_29] : memref<1x32x32xbf16, #tpu.memory_space<vmem>>, vector<1x32x32xbf16>
    %97 = vector.shape_cast %96 : vector<1x32x32xbf16> to vector<32x32xbf16>
    %cst_30 = arith.constant dense<0.000000e+00> : vector<8x32xf32>
    %98 = tpu.matmul %95, %97, %cst_30 {dimension_numbers = #tpu.dot_dimension_numbers<[1], [0], [0], [1], [0, 0, 1, 1], [], []>} : vector<8x32xbf16>, vector<32x32xbf16>, vector<8x32xf32> -> vector<8x32xf32>
    %c0_31 = arith.constant 0 : index
    %c0_32 = arith.constant 0 : index
    %c0_33 = arith.constant 0 : index
    %99 = vector.load %arg8[%c0_31, %c0_32, %c0_33] : memref<1x1x32xf32, #tpu.memory_space<vmem>>, vector<1x1x32xf32>
    %100 = vector.shape_cast %99 : vector<1x1x32xf32> to vector<1x32xf32>
    %101 = vector.broadcast %100 : vector<1x32xf32> to vector<8x32xf32>
    %102 = arith.addf %98, %101 : vector<8x32xf32>
    %103 = vector.shape_cast %102 : vector<8x32xf32> to vector<1x8x32xf32>
    %104 = arith.addf %3, %103 : vector<1x8x32xf32>
    %c0_34 = arith.constant 0 : index
    %c0_35 = arith.constant 0 : index
    %c0_36 = arith.constant 0 : index
    %105 = vector.load %arg9[%c0_34, %c0_35, %c0_36] : memref<1x1x32xf32, #tpu.memory_space<vmem>>, vector<1x1x32xf32>
    %106 = vector.shape_cast %105 : vector<1x1x32xf32> to vector<1x32xf32>
    %c0_37 = arith.constant 0 : index
    %c0_38 = arith.constant 0 : index
    %c0_39 = arith.constant 0 : index
    %107 = vector.load %arg10[%c0_37, %c0_38, %c0_39] : memref<1x1x32xf32, #tpu.memory_space<vmem>>, vector<1x1x32xf32>
    %108 = vector.shape_cast %107 : vector<1x1x32xf32> to vector<1x32xf32>
    %cst_40 = arith.constant dense<0.000000e+00> : vector<1x8xf32>
    %109 = vector.multi_reduction <add>, %104, %cst_40 [2] : vector<1x8x32xf32> to vector<1x8xf32>
    %110 = vector.shape_cast %109 : vector<1x8xf32> to vector<1x8x1xf32>
    %cst_41 = arith.constant 3.200000e+01 : f32
    %111 = vector.broadcast %cst_41 : f32 to vector<1x8x1xf32>
    %112 = arith.divf %110, %111 : vector<1x8x1xf32>
    %113 = vector.broadcast %112 : vector<1x8x1xf32> to vector<1x8x32xf32>
    %114 = arith.subf %104, %113 : vector<1x8x32xf32>
    %115 = arith.mulf %114, %114 : vector<1x8x32xf32>
    %cst_42 = arith.constant dense<0.000000e+00> : vector<1x8xf32>
    %116 = vector.multi_reduction <add>, %115, %cst_42 [2] : vector<1x8x32xf32> to vector<1x8xf32>
    %117 = vector.shape_cast %116 : vector<1x8xf32> to vector<1x8x1xf32>
    %cst_43 = arith.constant 3.200000e+01 : f32
    %118 = vector.broadcast %cst_43 : f32 to vector<1x8x1xf32>
    %119 = arith.divf %117, %118 : vector<1x8x1xf32>
    %120 = vector.broadcast %112 : vector<1x8x1xf32> to vector<1x8x32xf32>
    %121 = arith.subf %104, %120 : vector<1x8x32xf32>
    %cst_44 = arith.constant 9.99999974E-6 : f32
    %122 = vector.broadcast %cst_44 : f32 to vector<1x8x1xf32>
    %123 = arith.addf %119, %122 : vector<1x8x1xf32>
    %124 = math.rsqrt %123 : vector<1x8x1xf32>
    %125 = vector.broadcast %124 : vector<1x8x1xf32> to vector<1x8x32xf32>
    %126 = arith.mulf %121, %125 : vector<1x8x32xf32>
    %127 = vector.shape_cast %106 : vector<1x32xf32> to vector<1x1x32xf32>
    %128 = vector.broadcast %127 : vector<1x1x32xf32> to vector<1x8x32xf32>
    %129 = arith.mulf %126, %128 : vector<1x8x32xf32>
    %130 = vector.shape_cast %108 : vector<1x32xf32> to vector<1x1x32xf32>
    %131 = vector.broadcast %130 : vector<1x1x32xf32> to vector<1x8x32xf32>
    %132 = arith.addf %129, %131 : vector<1x8x32xf32>
    %133 = vector.shape_cast %132 : vector<1x8x32xf32> to vector<8x32xf32>
    %134 = arith.truncf %133 : vector<8x32xf32> to vector<8x32xbf16>
    %c0_45 = arith.constant 0 : index
    %c0_46 = arith.constant 0 : index
    %c0_47 = arith.constant 0 : index
    %135 = vector.load %arg11[%c0_45, %c0_46, %c0_47] : memref<1x32x128xbf16, #tpu.memory_space<vmem>>, vector<1x32x128xbf16>
    %136 = vector.shape_cast %135 : vector<1x32x128xbf16> to vector<32x128xbf16>
    %c0_48 = arith.constant 0 : index
    %c0_49 = arith.constant 0 : index
    %c0_50 = arith.constant 0 : index
    %137 = vector.load %arg12[%c0_48, %c0_49, %c0_50] : memref<1x1x128xf32, #tpu.memory_space<vmem>>, vector<1x1x128xf32>
    %138 = vector.shape_cast %137 : vector<1x1x128xf32> to vector<1x128xf32>
    %c0_51 = arith.constant 0 : index
    %c0_52 = arith.constant 0 : index
    %c0_53 = arith.constant 0 : index
    %139 = vector.load %arg13[%c0_51, %c0_52, %c0_53] : memref<1x128x32xbf16, #tpu.memory_space<vmem>>, vector<1x128x32xbf16>
    %140 = vector.shape_cast %139 : vector<1x128x32xbf16> to vector<128x32xbf16>
    %cst_54 = arith.constant dense<0.000000e+00> : vector<8x128xf32>
    %141 = tpu.matmul %134, %136, %cst_54 {dimension_numbers = #tpu.dot_dimension_numbers<[1], [0], [0], [1], [0, 0, 1, 1], [], []>} : vector<8x32xbf16>, vector<32x128xbf16>, vector<8x128xf32> -> vector<8x128xf32>
    %142 = vector.broadcast %138 : vector<1x128xf32> to vector<8x128xf32>
    %143 = arith.addf %141, %142 : vector<8x128xf32>
    %cst_55 = arith.constant 1.702000e+00 : f32
    %144 = vector.broadcast %cst_55 : f32 to vector<8x128xf32>
    %145 = arith.mulf %144, %143 : vector<8x128xf32>
    %146 = arith.negf %145 : vector<8x128xf32>
    %147 = math.exp %146 : vector<8x128xf32>
    %cst_56 = arith.constant 1.000000e+00 : f32
    %148 = vector.broadcast %cst_56 : f32 to vector<8x128xf32>
    %149 = arith.addf %148, %147 : vector<8x128xf32>
    %150 = arith.divf %148, %149 : vector<8x128xf32>
    %151 = arith.mulf %143, %150 : vector<8x128xf32>
    %152 = arith.truncf %151 : vector<8x128xf32> to vector<8x128xbf16>
    %cst_57 = arith.constant dense<0.000000e+00> : vector<8x32xf32>
    %153 = tpu.matmul %152, %140, %cst_57 {dimension_numbers = #tpu.dot_dimension_numbers<[1], [0], [0], [1], [0, 0, 1, 1], [], []>} : vector<8x128xbf16>, vector<128x32xbf16>, vector<8x32xf32> -> vector<8x32xf32>
    %c0_58 = arith.constant 0 : index
    %c0_59 = arith.constant 0 : index
    %c0_60 = arith.constant 0 : index
    %154 = vector.load %arg14[%c0_58, %c0_59, %c0_60] : memref<1x1x32xf32, #tpu.memory_space<vmem>>, vector<1x1x32xf32>
    %155 = vector.shape_cast %154 : vector<1x1x32xf32> to vector<1x32xf32>
    %156 = vector.broadcast %155 : vector<1x32xf32> to vector<8x32xf32>
    %157 = arith.addf %153, %156 : vector<8x32xf32>
    %158 = vector.shape_cast %157 : vector<8x32xf32> to vector<1x8x32xf32>
    %159 = arith.addf %104, %158 : vector<1x8x32xf32>
    %c0_61 = arith.constant 0 : index
    %c0_62 = arith.constant 0 : index
    %c0_63 = arith.constant 0 : index
    %160 = vector.load %arg16[%c0_61, %c0_62, %c0_63] : memref<1x8x32xf32, #tpu.memory_space<vmem>>, vector<1x8x32xf32>
    tpu.vector_store %arg16[%c0_61, %c0_62, %c0_63], %159 {strides = array<i32>} : memref<1x8x32xf32, #tpu.memory_space<vmem>>, vector<1x8x32xf32>,
    %c1_i32 = arith.constant 1 : i32
    %161 = arith.cmpi eq, %arg1, %c1_i32 : i32
    %162 = arith.extui %161 : i1 to i32
    %c0_i32_64 = arith.constant 0 : i32
    %163 = arith.cmpi ne, %162, %c0_i32_64 : i32
    scf.if %163 {
      %c0_65 = arith.constant 0 : index
      %c0_66 = arith.constant 0 : index
      %c0_67 = arith.constant 0 : index
      %164 = vector.load %arg15[%c0_65, %c0_66, %c0_67] : memref<1x8x32xf32, #tpu.memory_space<vmem>>, vector<1x8x32xf32>
      tpu.vector_store %arg15[%c0_65, %c0_66, %c0_67], %159 {strides = array<i32>} : memref<1x8x32xf32, #tpu.memory_space<vmem>>, vector<1x8x32xf32>,
    } else {
    }
    return
  }
  func.func @transform_0(%arg0: i32, %arg1: i32) -> (i32, i32, i32) {
    %c0_i32 = arith.constant 0 : i32
    %c0_i32_0 = arith.constant 0 : i32
    %c0_i32_1 = arith.constant 0 : i32
    return %arg0, %c0_i32, %c0_i32_0 : i32, i32, i32
  }
  func.func @transform_1(%arg0: i32, %arg1: i32) -> (i32, i32, i32) {
    %c0_i32 = arith.constant 0 : i32
    %c0_i32_0 = arith.constant 0 : i32
    %c0_i32_1 = arith.constant 0 : i32
    return %arg1, %c0_i32, %c0_i32_0 : i32, i32, i32
  }
  func.func @transform_2(%arg0: i32, %arg1: i32) -> (i32, i32, i32) {
    %c0_i32 = arith.constant 0 : i32
    %c0_i32_0 = arith.constant 0 : i32
    %c0_i32_1 = arith.constant 0 : i32
    return %arg1, %c0_i32, %c0_i32_0 : i32, i32, i32
  }
  func.func @transform_3(%arg0: i32, %arg1: i32) -> (i32, i32, i32) {
    %c0_i32 = arith.constant 0 : i32
    %c0_i32_0 = arith.constant 0 : i32
    %c0_i32_1 = arith.constant 0 : i32
    return %arg1, %c0_i32, %c0_i32_0 : i32, i32, i32
  }
  func.func @transform_4(%arg0: i32, %arg1: i32) -> (i32, i32, i32) {
    %c0_i32 = arith.constant 0 : i32
    %c0_i32_0 = arith.constant 0 : i32
    %c0_i32_1 = arith.constant 0 : i32
    return %arg1, %c0_i32, %c0_i32_0 : i32, i32, i32
  }
  func.func @transform_5(%arg0: i32, %arg1: i32) -> (i32, i32, i32) {
    %c0_i32 = arith.constant 0 : i32
    %c0_i32_0 = arith.constant 0 : i32
    %c0_i32_1 = arith.constant 0 : i32
    return %arg1, %c0_i32, %c0_i32_0 : i32, i32, i32
  }
  func.func @transform_6(%arg0: i32, %arg1: i32) -> (i32, i32, i32) {
    %c0_i32 = arith.constant 0 : i32
    %c0_i32_0 = arith.constant 0 : i32
    %c0_i32_1 = arith.constant 0 : i32
    return %arg1, %c0_i32, %c0_i32_0 : i32, i32, i32
  }
  func.func @transform_7(%arg0: i32, %arg1: i32) -> (i32, i32, i32) {
    %c0_i32 = arith.constant 0 : i32
    %c0_i32_0 = arith.constant 0 : i32
    %c0_i32_1 = arith.constant 0 : i32
    return %arg1, %c0_i32, %c0_i32_0 : i32, i32, i32
  }
  func.func @transform_8(%arg0: i32, %arg1: i32) -> (i32, i32, i32) {
    %c0_i32 = arith.constant 0 : i32
    %c0_i32_0 = arith.constant 0 : i32
    %c0_i32_1 = arith.constant 0 : i32
    return %arg1, %c0_i32, %c0_i32_0 : i32, i32, i32
  }
  func.func @transform_9(%arg0: i32, %arg1: i32) -> (i32, i32, i32) {
    %c0_i32 = arith.constant 0 : i32
    %c0_i32_0 = arith.constant 0 : i32
    %c0_i32_1 = arith.constant 0 : i32
    return %arg1, %c0_i32, %c0_i32_0 : i32, i32, i32
  }
  func.func @transform_10(%arg0: i32, %arg1: i32) -> (i32, i32, i32) {
    %c0_i32 = arith.constant 0 : i32
    %c0_i32_0 = arith.constant 0 : i32
    %c0_i32_1 = arith.constant 0 : i32
    return %arg1, %c0_i32, %c0_i32_0 : i32, i32, i32
  }
  func.func @transform_11(%arg0: i32, %arg1: i32) -> (i32, i32, i32) {
    %c0_i32 = arith.constant 0 : i32
    %c0_i32_0 = arith.constant 0 : i32
    %c0_i32_1 = arith.constant 0 : i32
    return %arg1, %c0_i32, %c0_i32_0 : i32, i32, i32
  }
  func.func @transform_12(%arg0: i32, %arg1: i32) -> (i32, i32, i32) {
    %c0_i32 = arith.constant 0 : i32
    %c0_i32_0 = arith.constant 0 : i32
    %c0_i32_1 = arith.constant 0 : i32
    return %arg1, %c0_i32, %c0_i32_0 : i32, i32, i32
  }
  func.func @transform_13(%arg0: i32, %arg1: i32) -> (i32, i32, i32) {
    %c0_i32 = arith.constant 0 : i32
    %c0_i32_0 = arith.constant 0 : i32
    %c0_i32_1 = arith.constant 0 : i32
    return %arg0, %c0_i32, %c0_i32_0 : i32, i32, i32
  }
}

</mosaic_0001>

<bundles_post_ra>
// kernel: transformer_forward.1
= control target key start
LH: loop header
LB: loop body
LE: loop exit
PB: predicated region body
PF: predicated region fallthrough
CT: control target
= control target key end

     0   :  { %s2195_s25 = smov 0   ;;  %s2197_s26 = smov 0   ;;  %s2481_s0 = inlined_call_operand.vmem [shape: f32[2,8,32], index: 0, kind: input, shape index: {}]   ;;  %s2482_s1 = inlined_call_operand.vmem [shape: f32[2,1,32], index: 1, kind: input, shape index: {}]   ;;  %s2483_s2 = inlined_call_operand.vmem [shape: f32[2,1,32], index: 2, kind: input, shape index: {}]   ;;  %s2484_s3 = inlined_call_operand.vmem [shape: bf16[2,32,96], index: 3, kind: input, shape index: {}]   ;;  %s2485_s4 = inlined_call_operand.vmem [shape: f32[2,1,96], index: 4, kind: input, shape index: {}]   ;;  %s2486_s5 = inlined_call_operand.vmem [shape: bf16[2,32,32], index: 5, kind: input, shape index: {}]   ;;  %s2487_s6 = inlined_call_operand.vmem [shape: f32[2,1,32], index: 6, kind: input, shape index: {}]   ;;  %s2488_s7 = inlined_call_operand.vmem [shape: f32[2,1,32], index: 7, kind: input, shape index: {}]   ;;  %s2489_s8 = inlined_call_operand.vmem [shape: f32[2,1,32], index: 8, kind: input, shape index: {}]   ;;  %s2490_s9 = inlined_call_operand.vmem [shape: bf16[2,32,128], index: 9, kind: input, shape index: {}]   ;;  %s2491_s10 = inlined_call_operand.vmem [shape: f32[2,1,128], index: 10, kind: input, shape index: {}]   ;;  %s2492_s11 = inlined_call_operand.vmem [shape: bf16[2,128,32], index: 11, kind: input, shape index: {}]   ;;  %s2493_s12 = inlined_call_operand.vmem [shape: f32[2,1,32], index: 12, kind: input, shape index: {}]   ;;  %s2494_s13 = inlined_call_operand.vmem [shape: f32[2,8,32], index: 13, kind: output, shape index: {}]  }
   0x1   :  { %2499 = sst [smem:[#allocation9_spill]] %s2481_s0  ;;  %s2199_s27 = smov 0  }
   0x2   :  { %2500 = sst [smem:[#allocation10_spill]] %s2484_s3  ;;  %s2201_s28 = smov 0  }
   0x3   :  { %2501 = sst [smem:[#allocation11_spill]] %s2486_s5  ;;  %s2203_s29 = smov 0  }
   0x4   :  { %2502 = sst [smem:[#allocation12_spill]] %s2488_s7 }
   0x5   :  { %2503 = sst [smem:[#allocation13_spill]] %s2492_s11 }
   0x6   :  { %2504 = sst [smem:[#allocation14_spill]] %s2494_s13 }
   0x7 LB: > { %2505 = sst [smem:[#allocation3_spill]] %s2097_s25  ;;  %s32_s30 = sadd.s32 1, %s2105_s27  ;;  %s2113_s29 = sphi %s2203_s29, %s23_s29   ;;  %s2109_s28 = sphi %s2201_s28, %s2530_s28   ;;  %s2105_s27 = sphi %s2199_s27, %s2529_s27   ;;  %s2101_s26 = sphi %s2197_s26, %s2528_s26   ;;  %s2097_s25 = sphi %s2195_s25, %s2527_s25  }
   0x8   : > { %2506 = sst [smem:[#allocation4_spill]] %s2105_s27  ;;  %s35_s14 = sadd.s32 1, %s2109_s28 }
   0x9   : > { %2507 = sst [smem:[#allocation5_spill]] %s2109_s28  ;;  %p33_p0 = scmp.ge.s32.totalorder %s32_s30, 2 }
   0xa   : > { %2508 = sst [smem:[#allocation6_spill]] %s2113_s29  ;;  %p1784_p1 = scmp.ge.s32.totalorder %s2113_s29, 1 }
   0xb   : > { %p502_p2 = scmp.lt.s32.totalorder %s2113_s29, 5  ;;  %s2532_s30 = smov (%p33_p0, %s32_s30), 0 }
   0xc   : > { %2509 = sst [smem:[#allocation7_spill]] %s2532_s30  ;;  %s2534_s14 = smov (!%p33_p0, %s35_s14), %s2109_s28 }
   0xd   : > { %p503_p3 = pnand %p1784_p1, %p502_p2  ;;  %p37_p4 = scmp.ge.s32.totalorder %s2534_s14, 2 }
   0xe   : > { %p588_p5 = scmp.lt.s32.totalorder (!%p503_p3), %s2101_s26, 1  ;;  %p592_p6 = scmp.lt.s32.totalorder (!%p503_p3), %s2097_s25, 1 }
   0xf   : > { %s2536_s14 = smov (%p37_p4, %s2534_s14), 0  ;;  %506 = sbr.rel (%p503_p3) target bundleno = 2569 (0xa09), region = 72 }
  0x10   : > { %2510 = sst [smem:[#allocation8_spill]] %s2536_s14  ;;  %s2511_s0 = sld [smem:[#allocation9_spill]] (!%p503_p3) }
  0x11   : > { %s2512_s3 = sld [smem:[#allocation10_spill]] (!%p503_p3)  ;;  %s2513_s5 = sld [smem:[#allocation11_spill]] (!%p503_p3) }
  0x12   : > { %s2515_s14 = sld [smem:[#allocation13_spill]] (!%p503_p3)  ;;  %s2516_s28 = sld [smem:[#allocation14_spill]] (!%p503_p3) }
  0x16   : > { %s2538_s26 = smov (!%p588_p5, %s2101_s26), 1 }
  0x17   : > { %s2229_s15 = scalar_select %p592_p6, %s2097_s25, 1 }
  0x18   : > { %s1785_s16 = sshll.u32 %s2538_s26, 3 }
  0x19   : > { %s591_s19 = scalar_lea.vmem %s2511_s0, %s1785_s16  ;;  %s1835_s30 = sshll.u32 %s2229_s15, 4 }
  0x1a   : > { %s602_s29 = scalar_lea.vmem %s2512_s3, %s1835_s30  ;;  %s2253_s18 = scalar_lea.vmem %s2513_s5, %s1835_s30 }
  0x1b   : > { %s2270_s25 = scalar_lea.vmem %s2490_s9, %s1835_s30  ;;  %s627_s26 = scalar_lea.vmem %s2491_s10, %s2229_s15 }
  0x1c   : > { %s1838_s5 = sshll.u32 %s2229_s15, 6  ;;  %s635_s22 = scalar_lea.vmem %s2493_s12, %s2229_s15 }
  0x1d   : > { %s2284_s7 = scalar_lea.vmem %s2515_s14, %s1838_s5  ;;  %s2289_s3 = scalar_lea.vmem %s2516_s28, %s1785_s16 }
  0x1e   : > { %s2517_s30 = sld [smem:[#allocation3_spill]] }
  0x24   : > { %p1795_p7 = scmp.ne.s32.totalorder %s2517_s30, 0 }
  0x25   : > { %v645_v0 = vld [vmem:[%s591_s19] sm:$0xff] (!%p1795_p7)  ;;  %vm646_vm0 = vcmask (!%p1795_p7), 261120  }
  0x26   : > { %644 = sbr.rel (%p1795_p7) target bundleno = 45 (0x2d), region = 76  ;;  %647 = vst.msk [vmem:[#allocation2] sm:$0xff] (!%p1795_p7), %vm646_vm0, %v645_v0 }
  0x2d PF: > { %v2292_v1 = vld [vmem:[#allocation2] sm:$0xff]  ;;  %vm651_vm1 = vcmask 261120   ;;  %s2115_s5 = smov 96   ;;  %v2038_v4 = vld [vmem:[%s602_s29 + $0x8] sm:$0xff]   ;;  %s2116_s14 = smov 64   ;;  %v2117_v10 = vmov 0.0  }
  0x2e   : > { %v652_v2 = vsel %vm651_vm1, %v2292_v1, 0.0  ;;  %v2037_v3 = vld [vmem:[%s602_s29] sm:$0xff]   ;;  %1879 = vmatprep.subr.bf16.mxu0 %v2117_v10  ;;  %vm2118_vm2 = vmmov 0   ;;  %1903 = vmatprep.subr.bf16.mxu1 %v2117_v10  ;;  %s2518_s19 = scalar_lea.vmem %s2485_s4, %s2229_s15  ;;  %s2519_s11 = scalar_lea.vmem %s2482_s1, %s2229_s15  ;;  %vm870_vm3 = vcmask 64512   ;;  %vm1106_vm4 = vcmask 1043456  }
  0x2f   : > { %653 = vadd.xlane.f32.xlu0 %v652_v2  ;;  %749 = vrot.lane.b32.xlu1 %v2037_v3, %s2115_s5  ;;  %v2313_v11 = vld [vmem:[%s2518_s19] ss:$0 sm:$0xff]  ;;  %s2520_s21 = scalar_lea.vmem %s2483_s2, %s2229_s15  ;;  %s2119_s23 = smov 112   ;;  %vm1301_vm5 = vcmask 130048   ;;  %vm1303_vm6 = vcmask 195584  }
  0x30   : > { %1883 = vmatprep.mubr.msk.bf16.mxu0 %vm2118_vm2, %v2117_v10  ;;  %1880 = vmatpush3.bf16.msra.mxu0 %v2037_v3  ;;  %v1796_v16 = vld [vmem:[%s2519_s11] ss:$0 sm:$0xff]  ;;  %s2120_s24 = smov 120   ;;  %s2121_s0 = smov 104  }
  0x31   : > { %1881 = vmatprep.subr.bf16.mxu0 %v2117_v10  ;;  %1905 = vmatprep.mubr.msk.bf16.mxu1 %vm2118_vm2, %v2117_v10  ;;  %v1797_v19 = vld [vmem:[%s2520_s21] ss:$0 sm:$0xff]  ;;  %s2122_s27 = smov 8   ;;  %s2123_s30 = smov 16  }
  0x32   : > { %s2521_s29 = scalar_lea.vmem %s2487_s6, %s2229_s15  ;;  %s2522_s28 = sld [smem:[#allocation12_spill]] }
  0x33   : > { %751 = vrot.lane.b32.xlu1 %v2038_v4, %s2115_s5  ;;  %s2524_s20 = scalar_lea.vmem %s2489_s8, %s2229_s15 }
  0x34   : > { %1882 = vmatpush3.bf16.msra.mxu0 %v2038_v4 }
  0x35   : > { %1887 = vmatprep.subr.bf16.mxu0 %v2117_v10 }
  0x37   : > { %799 = vrot.lane.b32.xlu1 %v2037_v3, %s2116_s14 }
  0x38   : > { %s2523_s13 = scalar_lea.vmem %s2522_s28, %s2229_s15 }
  0x3b   : > { %801 = vrot.lane.b32.xlu1 %v2038_v4, %s2116_s14 }
  0xa1   : > { %v750_v17 = vpop.permute.xlu1 %749 }
  0xa5   : > { %v752_v23 = vpop.permute.xlu1 %751 }
  0xa9   : > { %v800_v24 = vpop.permute.xlu1 %799 }
  0xad   : > { %v802_v25 = vpop.permute.xlu1 %801 }
  0xbc   : > { %v654_v5 = vpop.xlane.xlu0 %653 }
  0xbd   : > { %v656_v6 = vmul.f32 0.03125, %v654_v5 }
  0xbf   : > { %v657_v7 = vsub.f32 %v2292_v1, %v656_v6 }
  0xc1   : > { %v658_v8 = vmul.f32 %v657_v7, %v657_v7 }
  0xc3   : > { %v659_v9 = vsel %vm651_vm1, %v658_v8, 0.0 }
  0xc4   : > { %660 = vadd.xlane.f32.xlu0 %v659_v9 }
  0xda   : > { %755 = vrot.lane.b32.xlu0 %v2313_v11, %s2115_s5  ;;  %s2124_s5 = smov 24  }
 0x151   : > { %v661_v12 = vpop.xlane.xlu0 %660 }
 0x152   : > { %v662_v13 = vmul.f32 0.03125, %v661_v12 }
 0x154   : > { %v663_v14 = vadd.f32 1e-05, %v662_v13 }
 0x155   : > { %v756_v33 = vpop.permute.xlu0 %755 }
 0x156   : > { %2051 = vrsqrt.f32 %v663_v14 }
 0x160   : > { %v2052_v15 = vpop.eup %2051 }
 0x161   : > { %v665_v18 = vmul.f32 %v2052_v15, %v657_v7 }
 0x163   : > { %v672_v20 = vmul.f32 %v1796_v16, %v665_v18 }
 0x165   : > { %v679_v21 = vadd.f32 %v1797_v19, %v672_v20 }
 0x167   : > { %v680_v22 = vpack.c.bf16 %v679_v21, %v679_v21 }
 0x169   : > { %1884 = vmatmul.mubr.msk.bf16.vlgmr.msra.gmra.mrb[0].mxu0 %vm651_vm1, %v680_v22 }
 0x16a   : > { %1888 = vmatpush3.bf16.msra.mxu0 %v750_v17  ;;  %1891 = vmatprep.mubr.msk.bf16.mxu0 %vm2118_vm2, %v2117_v10 }
 0x16b   : > { %1889 = vmatprep.subr.bf16.mxu0 %v2117_v10 }
 0x16e   : > { %1890 = vmatpush3.bf16.msra.mxu0 %v752_v23 }
 0x16f   : > { %1895 = vmatprep.subr.bf16.mxu0 %v2117_v10 }
 0x171   : > { %1892 = vmatmul.mubr.msk.bf16.vlgmr.msra.gmra.mrb[4].mxu0 %vm651_vm1, %v680_v22 }
 0x172   : > { %1896 = vmatpush3.bf16.msra.mxu0 %v800_v24  ;;  %1899 = vmatprep.mubr.msk.bf16.mxu0 %vm2118_vm2, %v2117_v10 }
 0x173   : > { %1897 = vmatprep.subr.bf16.mxu0 %v2117_v10 }
 0x176   : > { %1898 = vmatpush3.bf16.msra.mxu0 %v802_v25 }
 0x177   : > { %1909 = vmatprep.subr.bf16.mxu0 %v2117_v10 }
 0x179   : > { %1900 = vmatmul.mubr.msk.bf16.vlgmr.msra.gmra.mrb[8].mxu0 %vm651_vm1, %v680_v22 }
 0x17a   : > { %1911 = vmatprep.mubr.msk.bf16.mxu0 %vm2118_vm2, %v2117_v10 }
 0x23c   : > { %v741_v26 = vpop.f32.mrb[0].mxu0 }
 0x23d   : > { %v742_v27 = vadd.f32 %v2313_v11, %v741_v26  ;;  %v1885_v28 = vpop.f32.mrb[1].mxu0 }
 0x23e   : > { %v744_v29 = vpop.f32.mrb[2].mxu0 }
 0x23f   : > { %v747_v30 = vmul.f32 0.35355338, %v742_v27  ;;  %v1886_v31 = vpop.f32.mrb[3].mxu0 }
 0x241   : > { %v748_v32 = vpack.c.bf16 %v747_v30, %v747_v30 }
 0x243   : > { %852 = vrot.lane.b32.xlu0 %v748_v32, %s2119_s23  ;;  %850 = vrot.lane.b32.xlu1 %v748_v32, %s2120_s24 }
 0x244   : > { %v792_v34 = vpop.f32.mrb[4].mxu0 }
 0x245   : > { %v793_v35 = vadd.f32 %v792_v34, %v756_v33  ;;  %v1893_v36 = vpop.f32.mrb[5].mxu0 }
 0x246   : > { %v795_v37 = vpop.f32.mrb[6].mxu0 }
 0x247   : > { %v798_v38 = vpack.c.bf16 %v793_v35, %v793_v35  ;;  %v1894_v39 = vpop.f32.mrb[7].mxu0 }
 0x249   : > { %857 = vrot.lane.b32.xlu1 %v798_v38, %s2120_s24  ;;  %v875_v40 = vsel %vm870_vm3, %v798_v38, 0 }
 0x24a   : > { %1904 = vmatpush3.bf16.xpose.msra.mxu1 %v875_v40 }
 0x24b   : > { %1915 = vmatprep.subr.bf16.mxu1 %v2117_v10 }
 0x24c   : > { %v2345_v41 = vpop.f32.mrb[8].mxu0 }
 0x24d   : > { %v1901_v42 = vpop.f32.mrb[9].mxu0  ;;  %859 = vrot.lane.b32.xlu1 %v798_v38, %s2119_s23 }
 0x24e   : > { %v845_v43 = vpop.f32.mrb[10].mxu0 }
 0x24f   : > { %v1902_v44 = vpop.f32.mrb[11].mxu0 }
 0x251   : > { %861 = vrot.lane.b32.xlu1 %v798_v38, %s2121_s0  ;;  %1906 = vmatmul.mubr.msk.bf16.vlgmr.msra.gmra.mrb[0].mxu1 %vm870_vm3, %v748_v32 }
 0x252   : > { %1917 = vmatprep.mubr.msk.bf16.mxu1 %vm2118_vm2, %v2117_v10 }
 0x255   : > { %854 = vrot.lane.b32.xlu1 %v748_v32, %s2121_s0 }
 0x2b5   : > { %v851_v45 = vpop.permute.xlu1 %850  ;;  %v853_v52 = vpop.permute.xlu0 %852 }
 0x2bb   : > { %v858_v46 = vpop.permute.xlu1 %857 }
 0x2bc   : > { %v921_v47 = vsel %vm870_vm3, %v858_v46, 0 }
 0x2bd   : > { %1910 = vmatpush3.bf16.xpose.msra.mxu0 %v921_v47 }
 0x2be   : > { %1921 = vmatprep.subr.bf16.mxu0 %v2117_v10 }
 0x2bf   : > { %v860_v48 = vpop.permute.xlu1 %859 }
 0x2c0   : > { %v967_v49 = vsel %vm870_vm3, %v860_v48, 0 }
 0x2c1   : > { %1916 = vmatpush3.bf16.xpose.msra.mxu1 %v967_v49 }
 0x2c2   : > { %1927 = vmatprep.subr.bf16.mxu1 %v2117_v10 }
 0x2c3   : > { %v862_v50 = vpop.permute.xlu1 %861 }
 0x2c4   : > { %v1013_v51 = vsel %vm870_vm3, %v862_v50, 0  ;;  %1912 = vmatmul.mubr.msk.bf16.vlgmr.msra.gmra.mrb[12].mxu0 %vm870_vm3, %v851_v45 }
 0x2c5   : > { %1922 = vmatpush3.bf16.xpose.msra.mxu0 %v1013_v51  ;;  %1923 = vmatprep.mubr.msk.bf16.mxu0 %vm2118_vm2, %v2117_v10 }
 0x2c6   : > { %1933 = vmatprep.subr.bf16.mxu0 %v2117_v10 }
 0x2c7   : > { %v855_v53 = vpop.permute.xlu1 %854 }
 0x2c8   : > { %1918 = vmatmul.mubr.msk.bf16.vlgmr.msra.gmra.mrb[4].mxu1 %vm870_vm3, %v853_v52 }
 0x2c9   : > { %1929 = vmatprep.mubr.msk.bf16.mxu1 %vm2118_vm2, %v2117_v10 }
 0x2cc   : > { %1924 = vmatmul.mubr.msk.bf16.vlgmr.msra.gmra.mrb[16].mxu0 %vm870_vm3, %v855_v53 }
 0x2cd   : > { %1935 = vmatprep.mubr.msk.bf16.mxu0 %vm2118_vm2, %v2117_v10 }
 0x324   : > { %v911_v54 = vpop.f32.mrb[0].mxu1 }
 0x325   : > { %v1907_v55 = vpop.f32.mrb[1].mxu1  ;;  %v1055_v56 = vsel %vm870_vm3, %v911_v54, -inf }
 0x326   : > { %1056 = vmax.xlane.f32.xlu0 %v1055_v56  ;;  %v914_v57 = vpop.f32.mrb[2].mxu1 }
 0x327   : > { %v1908_v58 = vpop.f32.mrb[3].mxu1 }
 0x397   : > { %v957_v59 = vpop.f32.mrb[12].mxu0 }
 0x398   : > { %v1913_v60 = vpop.f32.mrb[13].mxu0  ;;  %v1058_v61 = vsel %vm870_vm3, %v957_v59, -inf }
 0x399   : > { %1059 = vmax.xlane.f32.xlu1 %v1058_v61  ;;  %v960_v62 = vpop.f32.mrb[14].mxu0 }
 0x39a   : > { %v1914_v63 = vpop.f32.mrb[15].mxu0  ;;  %v2039_v62 = vld [vmem:[%s2253_s18] sm:$0xff]  }
 0x39b   : > { %v1003_v0 = vpop.f32.mrb[4].mxu1  ;;  %v2040_v63 = vld [vmem:[%s2253_s18 + $0x8] sm:$0xff]  }
 0x39c   : > { %v1919_v2 = vpop.f32.mrb[5].mxu1  ;;  %v1061_v3 = vsel %vm870_vm3, %v1003_v0, -inf }
 0x39d   : > { %1062 = vmax.xlane.f32.xlu0 %v1061_v3  ;;  %v1006_v4 = vpop.f32.mrb[6].mxu1 }
 0x39e   : > { %v1920_v5 = vpop.f32.mrb[7].mxu1 }
 0x39f   : > { %v1049_v6 = vpop.f32.mrb[16].mxu0 }
 0x3a0   : > { %v1925_v7 = vpop.f32.mrb[17].mxu0  ;;  %v1064_v8 = vsel %vm870_vm3, %v1049_v6, -inf }
 0x3a1   : > { %v1052_v9 = vpop.f32.mrb[18].mxu0  ;;  %1065 = vmax.xlane.f32.xlu0 %v1064_v8 }
 0x3a2   : > { %v1926_v12 = vpop.f32.mrb[19].mxu0 }
 0x3aa   : > { %805 = vrot.lane.b32.xlu1 %v2313_v11, %s2116_s14 }
 0x3b3   : > { %v1057_v13 = vpop.xlane.xlu0 %1056 }
 0x3b4   : > { %v1067_v14 = vsub.f32 %v911_v54, %v1057_v13 }
 0x3b6   : > { %v1071_v15 = vmul.f32 1.442695, %v1067_v14 }
 0x3b8   : > { %2053 = vpow2.f32 %v1071_v15 }
 0x3c2   : > { %v2054_v16 = vpop.eup %2053 }
 0x3c3   : > { %v1079_v17 = vsel %vm870_vm3, %v2054_v16, 0.0 }
 0x3c4   : > { %1080 = vadd.xlane.f32.xlu0 %v1079_v17 }
 0x426   : > { %v1060_v18 = vpop.xlane.xlu1 %1059 }
 0x427   : > { %v1068_v19 = vsub.f32 %v957_v59, %v1060_v18 }
 0x429   : > { %v1073_v20 = vmul.f32 1.442695, %v1068_v19 }
 0x42a   : > { %v806_v21 = vpop.permute.xlu1 %805  ;;  %v1063_v22 = vpop.xlane.xlu0 %1062 }
 0x42b   : > { %2055 = vpow2.f32 %v1073_v20  ;;  %v843_v23 = vadd.f32 %v2345_v41, %v806_v21  ;;  %v1069_v24 = vsub.f32 %v1003_v0, %v1063_v22  ;;  %v1812_v22 = vld [vmem:[%s2521_s29] ss:$0 sm:$0xff] }
 0x42d   : > { %v848_v25 = vpack.c.bf16 %v843_v23, %v843_v23  ;;  %v1075_v11 = vmul.f32 1.442695, %v1069_v24 }
 0x42e   : > { %v1066_v26 = vpop.xlane.xlu0 %1065 }
 0x42f   : > { %2057 = vpow2.f32 %v1075_v11  ;;  %v1070_v27 = vsub.f32 %v1049_v6, %v1066_v26  ;;  %866 = vrot.lane.b32.xlu1 %v848_v25, %s2119_s23  ;;  %v1108_v28 = vsel %vm1106_vm4, %v848_v25, 0 }
 0x430   : > { %1928 = vmatpush3.bf16.msra.mxu1 %v1108_v28 }
 0x431   : > { %v1077_v29 = vmul.f32 1.442695, %v1070_v27  ;;  %1939 = vmatprep.subr.bf16.mxu1 %v2117_v10 }
 0x433   : > { %2059 = vpow2.f32 %v1077_v29  ;;  %868 = vrot.lane.b32.xlu1 %v848_v25, %s2121_s0 }
 0x435   : > { %v2056_v30 = vpop.eup %2055 }
 0x436   : > { %v1082_v31 = vsel %vm870_vm3, %v2056_v30, 0.0 }
 0x437   : > { %1083 = vadd.xlane.f32.xlu0 %v1082_v31 }
 0x439   : > { %v2058_v32 = vpop.eup %2057 }
 0x43a   : > { %v1085_v33 = vsel %vm870_vm3, %v2058_v32, 0.0 }
 0x43b   : > { %1086 = vadd.xlane.f32.xlu0 %v1085_v33 }
 0x43d   : > { %v2060_v34 = vpop.eup %2059 }
 0x43e   : > { %v1088_v35 = vsel %vm870_vm3, %v2060_v34, 0.0 }
 0x43f   : > { %1089 = vadd.xlane.f32.xlu0 %v1088_v35 }
 0x451   : > { %v1081_v36 = vpop.xlane.xlu0 %1080 }
 0x452   : > { %2061 = vrcp.f32 %v1081_v36 }
 0x455   : > { %864 = vrot.lane.b32.xlu0 %v848_v25, %s2120_s24 }
 0x45c   : > { %v2062_v37 = vpop.eup %2061 }
 0x45d   : > { %v1095_v38 = vmul.f32 %v2062_v37, %v2054_v16 }
 0x45f   : > { %v1099_v39 = vpack.c.bf16 %v1095_v38, %v1095_v38 }
 0x461   : > { %1930 = vmatmul.mubr.msk.bf16.vlgmr.msra.gmra.mrb[8].mxu1 %vm870_vm3, %v1099_v39  ;;  %v1816_v39 = vld [vmem:[%s2523_s13] ss:$0 sm:$0xff] }
 0x462   : > { %1941 = vmatprep.mubr.msk.bf16.mxu1 %vm2118_vm2, %v2117_v10 }
 0x4a1   : > { %v867_v40 = vpop.permute.xlu1 %866 }
 0x4a2   : > { %v1200_v41 = vsel %vm1106_vm4, %v867_v40, 0 }
 0x4a3   : > { %1940 = vmatpush3.bf16.msra.mxu1 %v1200_v41  ;;  %v1817_v41 = vld [vmem:[%s2524_s20] ss:$0 sm:$0xff] }
 0x4a4   : > { %1951 = vmatprep.subr.bf16.mxu1 %v2117_v10 }
 0x4a5   : > { %v869_v49 = vpop.permute.xlu1 %868 }
 0x4a6   : > { %v1246_v53 = vsel %vm1106_vm4, %v869_v49, 0  ;;  %v2047_v49 = vld [vmem:[%s2284_s7 + $0x20] sm:$0xff]  }
 0x4c4   : > { %v1084_v42 = vpop.xlane.xlu0 %1083 }
 0x4c5   : > { %2063 = vrcp.f32 %v1084_v42 }
 0x4c8   : > { %v1087_v43 = vpop.xlane.xlu0 %1086 }
 0x4c9   : > { %2065 = vrcp.f32 %v1087_v43 }
 0x4cc   : > { %v1090_v44 = vpop.xlane.xlu0 %1089 }
 0x4cd   : > { %2067 = vrcp.f32 %v1090_v44 }
 0x4cf   : > { %v2064_v45 = vpop.eup %2063 }
 0x4d0   : > { %v1096_v46 = vmul.f32 %v2064_v45, %v2056_v30  ;;  %v865_v47 = vpop.permute.xlu0 %864  ;;  %v2043_v45 = vld [vmem:[%s2284_s7] sm:$0xff]  }
 0x4d1   : > { %v1154_v48 = vsel %vm1106_vm4, %v865_v47, 0  ;;  %v2045_v47 = vld [vmem:[%s2284_s7 + $0x10] sm:$0xff]  }
 0x4d2   : > { %1934 = vmatpush3.bf16.msra.mxu0 %v1154_v48  ;;  %v1100_v50 = vpack.c.bf16 %v1096_v46, %v1096_v46  ;;  %v2044_v46 = vld [vmem:[%s2284_s7 + $0x8] sm:$0xff]   ;;  %v2046_v48 = vld [vmem:[%s2284_s7 + $0x18] sm:$0xff]  }
 0x4d3   : > { %v2066_v51 = vpop.eup %2065  ;;  %1945 = vmatprep.subr.bf16.mxu0 %v2117_v10 }
 0x4d4   : > { %v1097_v52 = vmul.f32 %v2066_v51, %v2058_v32  ;;  %v2049_v51 = vld [vmem:[%s2284_s7 + $0x30] sm:$0xff]  }
 0x4d5   : > { %1936 = vmatmul.mubr.msk.bf16.vlgmr.msra.gmra.mrb[20].mxu0 %vm870_vm3, %v1100_v50  ;;  %v2048_v50 = vld [vmem:[%s2284_s7 + $0x28] sm:$0xff]  }
 0x4d6   : > { %1946 = vmatpush3.bf16.msra.mxu0 %v1246_v53  ;;  %v1101_v54 = vpack.c.bf16 %v1097_v52, %v1097_v52  ;;  %1947 = vmatprep.mubr.msk.bf16.mxu0 %vm2118_vm2, %v2117_v10  ;;  %v2050_v52 = vld [vmem:[%s2284_s7 + $0x38] sm:$0xff]   ;;  %v1818_v53 = vld [vmem:[%s627_s26] ss:$0 sm:$0xff]  ;;  %s2525_s26 = sld [smem:[#allocation3_spill]] }
 0x4d7   : > { %v2068_v55 = vpop.eup %2067  ;;  %1959 = vmatprep.subr.bf16.mxu0 %v2117_v10 }
 0x4d8   : > { %v1098_v56 = vmul.f32 %v2068_v55, %v2060_v34  ;;  %1942 = vmatmul.mubr.msk.bf16.vlgmr.msra.gmra.mrb[12].mxu1 %vm870_vm3, %v1101_v54  ;;  %v2041_v34 = vld [vmem:[%s2270_s25] sm:$0xff]  }
 0x4d9   : > { %1955 = vmatprep.mubr.msk.bf16.mxu1 %vm2118_vm2, %v2117_v10  ;;  %1952 = vmatpush3.bf16.msra.mxu1 %v2039_v62 }
 0x4da   : > { %v1102_v57 = vpack.c.bf16 %v1098_v56, %v1098_v56  ;;  %1953 = vmatprep.subr.bf16.mxu1 %v2117_v10 }
 0x4dc   : > { %p1832_p8 = scmp.ne.s32.totalorder %s2525_s26, 1 }
 0x4dd   : > { %1948 = vmatmul.mubr.msk.bf16.vlgmr.msra.gmra.mrb[24].mxu0 %vm870_vm3, %v1102_v57  ;;  %1954 = vmatpush3.bf16.msra.mxu1 %v2040_v63 }
 0x4de   : > { %1963 = vmatprep.mubr.msk.bf16.mxu0 %vm2118_vm2, %v2117_v10  ;;  %1967 = vmatprep.subr.bf16.mxu1 %v2117_v10 }
 0x4df   : > { %1960 = vmatpush3.bf16.msra.mxu0 %v2041_v34 }
 0x4e0   : > { %1961 = vmatprep.subr.bf16.mxu0 %v2117_v10 }
 0x534   : > { %v1144_v58 = vpop.f32.mrb[8].mxu1 }
 0x535   : > { %v1931_v59 = vpop.f32.mrb[9].mxu1 }
 0x536   : > { %v1147_v60 = vpop.f32.mrb[10].mxu1 }
 0x537   : > { %v1932_v61 = vpop.f32.mrb[11].mxu1 }
 0x5a8   : > { %v1190_v0 = vpop.f32.mrb[20].mxu0 }
 0x5a9   : > { %1289 = vrot.lane.b32.xlu1 %v1190_v0, %s2122_s27  ;;  %v1937_v2 = vpop.f32.mrb[21].mxu0 }
 0x5aa   : > { %v1193_v3 = vpop.f32.mrb[22].mxu0  ;;  %v1823_v2 = vld [vmem:[%s635_s22] ss:$0 sm:$0xff] }
 0x5ab   : > { %v1938_v4 = vpop.f32.mrb[23].mxu0  ;;  %v1236_v5 = vpop.f32.mrb[12].mxu1 }
 0x5ac   : > { %v1943_v6 = vpop.f32.mrb[13].mxu1 }
 0x5ad   : > { %v1239_v7 = vpop.f32.mrb[14].mxu1  ;;  %1293 = vrot.lane.b32.xlu1 %v1236_v5, %s2123_s30 }
 0x5ae   : > { %v1944_v8 = vpop.f32.mrb[15].mxu1 }
 0x5b0   : > { %v1282_v9 = vpop.f32.mrb[24].mxu0 }
 0x5b1   : > { %1297 = vrot.lane.b32.xlu1 %v1282_v9, %s2124_s5  ;;  %v1949_v12 = vpop.f32.mrb[25].mxu0 }
 0x5b2   : > { %v1285_v13 = vpop.f32.mrb[26].mxu0 }
 0x5b3   : > { %v1950_v14 = vpop.f32.mrb[27].mxu0 }
 0x61b   : > { %v1290_v15 = vpop.permute.xlu1 %1289 }
 0x61c   : > { %v1300_v17 = vsel %vm870_vm3, %v1144_v58, %v1290_v15 }
 0x61f   : > { %v1294_v16 = vpop.permute.xlu1 %1293 }
 0x620   : > { %v1302_v18 = vsel %vm1301_vm5, %v1300_v17, %v1294_v16 }
 0x623   : > { %v1298_v19 = vpop.permute.xlu1 %1297 }
 0x624   : > { %v1304_v20 = vsel %vm1303_vm6, %v1302_v18, %v1298_v19 }
 0x625   : > { %v1305_v21 = vpack.c.bf16 %v1304_v20, %v1304_v20 }
 0x627   : > { %1956 = vmatmul.mubr.msk.bf16.vlgmr.msra.gmra.mrb[16].mxu1 %vm651_vm1, %v1305_v21 }
 0x628   : > { %1983 = vmatprep.mubr.msk.bf16.mxu1 %vm2118_vm2, %v2117_v10  ;;  %1968 = vmatpush3.bf16.msra.mxu1 %v2043_v45 }
 0x629   : > { %1969 = vmatprep.subr.bf16.mxu1 %v2117_v10 }
 0x62c   : > { %1970 = vmatpush3.bf16.msra.mxu1 %v2044_v46 }
 0x62d   : > { %1971 = vmatprep.subr.bf16.mxu1 %v2117_v10 }
 0x630   : > { %1972 = vmatpush3.bf16.msra.mxu1 %v2045_v47 }
 0x631   : > { %1973 = vmatprep.subr.bf16.mxu1 %v2117_v10 }
 0x634   : > { %1974 = vmatpush3.bf16.msra.mxu1 %v2046_v48 }
 0x635   : > { %1975 = vmatprep.subr.bf16.mxu1 %v2117_v10 }
 0x638   : > { %1976 = vmatpush3.bf16.msra.mxu1 %v2047_v49 }
 0x639   : > { %1977 = vmatprep.subr.bf16.mxu1 %v2117_v10 }
 0x63c   : > { %1978 = vmatpush3.bf16.msra.mxu1 %v2048_v50 }
 0x63d   : > { %1979 = vmatprep.subr.bf16.mxu1 %v2117_v10 }
 0x640   : > { %1980 = vmatpush3.bf16.msra.mxu1 %v2049_v51 }
 0x641   : > { %1981 = vmatprep.subr.bf16.mxu1 %v2117_v10 }
 0x644   : > { %1982 = vmatpush3.bf16.msra.mxu1 %v2050_v52 }
 0x6fa   : > { %v1366_v23 = vpop.f32.mrb[16].mxu1 }
 0x6fb   : > { %v1367_v24 = vadd.f32 %v1812_v22, %v1366_v23  ;;  %v1957_v25 = vpop.f32.mrb[17].mxu1 }
 0x6fc   : > { %v1369_v11 = vpop.f32.mrb[18].mxu1 }
 0x6fd   : > { %v2416_v26 = vadd.f32 %v1367_v24, %v2292_v1  ;;  %v1958_v27 = vpop.f32.mrb[19].mxu1  ;;  %v2042_v1 = vld [vmem:[%s2270_s25 + $0x8] sm:$0xff]  }
 0x6fe   : > { %1962 = vmatpush3.bf16.msra.mxu0 %v2042_v1 }
 0x6ff   : > { %v1375_v28 = vsel %vm651_vm1, %v2416_v26, 0.0 }
 0x700   : > { %1376 = vadd.xlane.f32.xlu1 %v1375_v28 }
 0x78d   : > { %v1377_v29 = vpop.xlane.xlu1 %1376 }
 0x78e   : > { %v1378_v30 = vmul.f32 0.03125, %v1377_v29 }
 0x790   : > { %v1379_v31 = vsub.f32 %v2416_v26, %v1378_v30 }
 0x792   : > { %v1380_v32 = vmul.f32 %v1379_v31, %v1379_v31 }
 0x794   : > { %v1381_v33 = vsel %vm651_vm1, %v1380_v32, 0.0 }
 0x795   : > { %1382 = vadd.xlane.f32.xlu0 %v1381_v33 }
 0x822   : > { %v1383_v35 = vpop.xlane.xlu0 %1382 }
 0x823   : > { %v1384_v36 = vmul.f32 0.03125, %v1383_v35 }
 0x825   : > { %v1385_v37 = vadd.f32 1e-05, %v1384_v36 }
 0x827   : > { %2069 = vrsqrt.f32 %v1385_v37 }
 0x831   : > { %v2070_v38 = vpop.eup %2069 }
 0x832   : > { %v1387_v40 = vmul.f32 %v2070_v38, %v1379_v31 }
 0x834   : > { %v1394_v42 = vmul.f32 %v1816_v39, %v1387_v40 }
 0x836   : > { %v1401_v43 = vadd.f32 %v1817_v41, %v1394_v42 }
 0x838   : > { %v1402_v44 = vpack.c.bf16 %v1401_v43, %v1401_v43 }
 0x83a   : > { %1964 = vmatmul.mubr.msk.bf16.vlgmr.msra.gmra.mrb[28].mxu0 %vm651_vm1, %v1402_v44 }
 0x90d   : > { %v1479_v54 = vpop.f32.mrb[28].mxu0 }
 0x90e   : > { %v1480_v55 = vadd.f32 %v1818_v53, %v1479_v54  ;;  %v1965_v56 = vpop.f32.mrb[29].mxu0 }
 0x90f   : > { %v1482_v57 = vpop.f32.mrb[30].mxu0 }
 0x910   : > { %v1822_v58 = vmul.f32 -1.702, %v1480_v55  ;;  %v1966_v59 = vpop.f32.mrb[31].mxu0 }
 0x912   : > { %v1487_v60 = vmul.f32 1.442695, %v1822_v58 }
 0x914   : > { %2071 = vpow2.f32 %v1487_v60 }
 0x91e   : > { %v2072_v61 = vpop.eup %2071 }
 0x91f   : > { %v1489_v62 = vadd.f32 1.0, %v2072_v61 }
 0x921   : > { %2073 = vrcp.f32 %v1489_v62 }
 0x92b   : > { %v2074_v10 = vpop.eup %2073 }
 0x92c   : > { %v1492_v63 = vmul.f32 %v2074_v10, %v1480_v55 }
 0x92e   : > { %v1493_v0 = vpack.c.bf16 %v1492_v63, %v1492_v63 }
 0x930   : > { %1984 = vmatmul.mubr.bf16.vlgmr.msra.gmra.mrb[20].mxu1 %v1493_v0 }
 0xa02   : > { %1594 = sbr.rel (%p1832_p8) target bundleno = 2569 (0xa09), region = 80 }
 0xa03   : > { %v1583_v3 = vpop.f32.mrb[20].mxu1 }
 0xa04   : > { %v1584_v4 = vadd.f32 %v1823_v2, %v1583_v3  ;;  %v1985_v5 = vpop.f32.mrb[21].mxu1 }
 0xa05   : > { %v1586_v6 = vpop.f32.mrb[22].mxu1 }
 0xa06   : > { %v1589_v7 = vadd.f32 %v1584_v4, %v2416_v26  ;;  %v1986_v8 = vpop.f32.mrb[23].mxu1 }
 0xa08   : > { %1590 = vst.msk [vmem:[#allocation2] sm:$0xff] %vm651_vm1, %v1589_v7  ;;  %1595 = vst.msk [vmem:[%s2289_s3] sm:$0xff] (!%p1832_p8), %vm651_vm1, %v1589_v7 }
 0xa09 PF: > { %s2526_s24 = sld [smem:[#allocation6_spill]]  ;;  %s2527_s25 = sld [smem:[#allocation4_spill]] }
 0xa0a   : > { %s2528_s26 = sld [smem:[#allocation5_spill]]  ;;  %s2529_s27 = sld [smem:[#allocation7_spill]] }
 0xa0b   : > { %s2530_s28 = sld [smem:[#allocation8_spill]] }
 0xa0f   : > { %s23_s29 = sadd.s32 1, %s2526_s24  }
 0xa10   : > { %p20_p9 = scmp.ge.s32.totalorder %s23_s29, 6  }
 0xa12   :  { %22 = sbr.rel (!%p20_p9) target bundleno = 7 (0x7), region = 146 }

</bundles_post_ra>
